<compile_context>
chip_gen: v5e
topology: v5e:2x2
jax: 0.10.0
libtpu: 0.0.40
codegen_flags: <defaults>
</compile_context>

<pallas_src>
from functools import partial

import jax
import jax.numpy as jnp
from jax.experimental import pallas as pl
from jax.experimental.pallas import tpu as pltpu

_LANE = 128
_SUBLANE = 8
_NEG_BIG = -1e30  # f32 softmax pad bias -> exp() underflows to exactly 0


def _round_up(v, m):
    return ((v + m - 1) // m) * m


def _diffpool_kernel(x_ref, adj_ref, w_ref, b_ref, newx_ref, newadj_ref, *,
                     normalize_embedding, f_out_p, c_rows):
    """Processes a block of G graphs per grid step.

    x_ref   : (G, N, F_in)         bf16  (RHS of the adj @ x matmul)
    adj_ref : (G, N, N)            bf16  (exact for 0/1 adjacency)
    w_ref   : (F_in, F_out_p+C_p)  f32   fused [W_embed | W_assign], zero-padded
    b_ref   : (1, F_out_p+C_p)     f32   fused bias; -1e30 in padded assign lanes
    newx_ref   : (G, c_rows, F_out_p) f32
    newadj_ref : (G, c_rows, C_p)     f32
    """
    adj = adj_ref[...]                      # (G, N, N)    bf16
    x = x_ref[...]                          # (G, N, F_in) bf16
    g, n, f_in = x.shape

    # --- GNN "sum" aggregation: h = A~ @ X  (bf16 MXU operands, f32 accum) ---
    h = jnp.einsum('gnm,gmf->gnf', adj, x,
                   preferred_element_type=jnp.float32)       # (G, N, F_in) f32

    # --- fused embedding + assignment linear layers across all G graphs -----
    # single (G*N, F_in) @ (F_in, F_out_p + C_p) matmul instead of 2*G small ones
    h2 = h.reshape(g * n, f_in)
    zs = jnp.dot(h2, w_ref[...], preferred_element_type=jnp.float32) + b_ref[...]

    # embedding branch: Z = relu(.), L2 row-normalized; padded lanes stay 0
    z = jnp.maximum(zs[:, :f_out_p], 0.0)
    if normalize_embedding:
        z = z * jax.lax.rsqrt(jnp.sum(z * z, axis=-1, keepdims=True) + 1e-12)

    # assignment branch: S = softmax(.); padded lanes carry -1e30 bias -> exp==0
    logits = zs[:, f_out_p:]
    m = jnp.max(logits, axis=-1, keepdims=True)
    e = jnp.exp(logits - m)
    s = e * pl.reciprocal(jnp.sum(e, axis=-1, keepdims=True), approx=True)

    z = z.reshape(g, n, f_out_p)            # (G, N, F_out_p)
    s = s.reshape(g, n, -1)                 # (G, N, C_p)

    # --- single explicit transpose of S, row-sliced to c_rows, reused twice --
    # rows c..c_rows-1 of S^T correspond to exactly-zero softmax pad columns.
    s_t = jnp.swapaxes(s, -1, -2)[:, :c_rows, :]              # (G, c_rows, N)

    # newX = S^T @ Z     (lane-dense (c_rows, F_out_p) store, f32)
    newx_ref[...] = jnp.einsum('gcn,gnf->gcf', s_t, z,
                               preferred_element_type=jnp.float32)

    # newAdj = (S^T @ A~) @ S     (adjacency contraction in bf16, f32 accum)
    sta = jnp.einsum('gcn,gnm->gcm', s_t.astype(jnp.bfloat16), adj,
                     preferred_element_type=jnp.float32)      # (G, c_rows, N)
    newadj_ref[...] = jnp.einsum('gcm,gmk->gck', sta, s,
                                 preferred_element_type=jnp.float32)


def diffpool_layer(x, adj, w_embed, b_embed, w_assign, b_assign, *,
                   normalize_embedding=True, block_graphs=None):
    """Batched DiffPool forward.

    x: (B, N, F_in) or (N, F_in); adj: (B, N, N) or (N, N)
    returns (newX: (B, C, F_out), newAdj: (B, C, C)) (batch dim squeezed if the
    inputs were unbatched).
    """
    squeeze = (x.ndim == 2)
    if squeeze:
        x, adj = x[None], adj[None]

    B, N, f_in = x.shape
    f_out = int(w_embed.shape[1])
    c = int(w_assign.shape[1])

    f_out_p = _round_up(f_out, _LANE)        # lane-dense newX feature dim
    c_p = _round_up(c, _LANE)                # lane-dense softmax / newAdj dim
    c_rows = _round_up(c, _SUBLANE)          # row (sublane) pad only: 8, not 128
    ncat_p = f_out_p + c_p

    # bf16 MXU operands for the adjacency path.  adj is exact in bf16 for 0/1
    # graphs (and halves the dominant HBM stream / VMEM buffer); x only feeds
    # the adj @ x matmul.  Weighted adjacencies incur bf16 rounding (~0.4%).
    x_in = x.astype(jnp.bfloat16)
    adj_in = adj.astype(jnp.bfloat16)

    # Fused, lane-padded [W_embed | W_assign] and biases (padding is exact:
    # zero weight columns; zero bias pad for Z, -1e30 bias pad for softmax).
    w_cat = jnp.zeros((f_in, ncat_p), jnp.float32)
    w_cat = w_cat.at[:, :f_out].set(w_embed.astype(jnp.float32))
    w_cat = w_cat.at[:, f_out_p:f_out_p + c].set(w_assign.astype(jnp.float32))
    b_cat = jnp.zeros((1, ncat_p), jnp.float32)
    b_cat = b_cat.at[0, :f_out].set(b_embed.astype(jnp.float32))
    b_cat = b_cat.at[0, f_out_p:].set(_NEG_BIG)
    b_cat = b_cat.at[0, f_out_p:f_out_p + c].set(b_assign.astype(jnp.float32))

    # --- VMEM capacity (v7x: 64 MiB/TC; v5e/v6e: 128 MiB) --------------------
    vmem_cap = 64 << 20
    try:
        vmem_cap = int(pltpu.get_tpu_info().vmem_capacity_bytes)
    except Exception:
        pass  # conservative 64 MiB fallback

    # --- how many graphs per grid step (amortize per-step overhead) ----------
    def step_bytes(g):
        blk_in = g * (N * f_in + N * N) * 2                   # bf16 inputs
        blk_out = g * c_rows * (f_out_p + c_p) * 4            # f32 outputs
        interm = g * N * (f_in + 3 * ncat_p) * 4              # h, zs, z, s, ...
        wts = (f_in + 1) * ncat_p * 4
        return 2 * (blk_in + blk_out) + 2 * wts + interm      # double-buffered

    if block_graphs is None:
        budget = max(8 << 20, vmem_cap // 3)
        g_pick = 1
        for d in range(1, B + 1):
            if B % d:
                continue
            if d > 1 and B // d < 2:
                continue      # keep >= 2 grid steps (pipelining / 2nd TC on v7x)
            if step_bytes(d) <= budget:
                g_pick = d
        block_graphs = g_pick
    assert B % block_graphs == 0
    G = block_graphs

    vmem_limit = min(vmem_cap - (4 << 20),
                     max(32 << 20, step_bytes(G) + (8 << 20)))
    vmem_limit = max(vmem_limit, 16 << 20)

    # --- advisory cost estimate (uses c_rows, not c_p, for the S^T matmuls) --
    mm_flops = 2 * (N * N * f_in            # adj @ x
                    + N * f_in * ncat_p     # fused h @ [W_e | W_s]
                    + c_rows * N * f_out_p  # S^T @ Z
                    + c_rows * N * N        # S^T @ A
                    + c_rows * N * c_p)     # (S^T A) @ S
    cost = pl.CostEstimate(
        flops=int(B * mm_flops),
        transcendentals=int(B * (N * c_p + 2 * N)),      # exp + rsqrt + recip
        bytes_accessed=int(B * (2 * (N * f_in + N * N)
                                + 4 * c_rows * (f_out_p + c_p))
                           + 4 * (f_in + 1) * ncat_p),
    )

    kernel = partial(_diffpool_kernel,
                     normalize_embedding=normalize_embedding,
                     f_out_p=f_out_p, c_rows=c_rows)

    newx_p, newadj_p = pl.pallas_call(
        kernel,
        grid=(B // G,),
        out_shape=(jax.ShapeDtypeStruct((B, c_rows, f_out_p), jnp.float32),
                   jax.ShapeDtypeStruct((B, c_rows, c_p), jnp.float32)),
        in_specs=[
            pl.BlockSpec((G, N, f_in), lambda b: (b, 0, 0)),    # x   (bf16)
            pl.BlockSpec((G, N, N), lambda b: (b, 0, 0)),       # adj (bf16)
            pl.BlockSpec((f_in, ncat_p), lambda b: (0, 0)),     # [W_e|W_s]
            pl.BlockSpec((1, ncat_p), lambda b: (0, 0)),        # [b_e|b_s]
        ],
        out_specs=(
            pl.BlockSpec((G, c_rows, f_out_p), lambda b: (b, 0, 0)),
            pl.BlockSpec((G, c_rows, c_p), lambda b: (b, 0, 0)),
        ),
        compiler_params=pltpu.CompilerParams(
            dimension_semantics=("parallel",),
            vmem_limit_bytes=int(vmem_limit)),
        cost_estimate=cost,
    )(x_in, adj_in, w_cat, b_cat)

    new_x = newx_p[:, :c, :f_out]
    new_adj = newadj_p[:, :c, :c]
    if squeeze:
        new_x, new_adj = new_x[0], new_adj[0]
    return new_x, new_adj


def _reference_single(x, adj, we, be, ws, bs, normalize_embedding=True):
    h = adj @ x
    z = jnp.maximum(h @ we + be, 0.0)
    if normalize_embedding:
        z = z / jnp.sqrt(jnp.sum(z * z, axis=-1, keepdims=True) + 1e-12)
    s = jax.nn.softmax(h @ ws + bs, axis=-1)
    return s.T @ z, s.T @ adj @ s


if __name__ == "__main__":
    key = jax.random.PRNGKey(0)
    k1, k2, k3, k4 = jax.random.split(key, 4)

    # module hyperparameters: input_dim_size=8, new_feat_dim_size=32,
    # new_num_nodes=4; 4 graphs of 16 nodes each.
    B, N, F_IN, F_OUT, C = 4, 16, 8, 32, 4

    x = jax.random.normal(k1, (B, N, F_IN), dtype=jnp.float32)

    a = jax.random.uniform(k2, (B, N, N), dtype=jnp.float32)
    adj = ((a + jnp.swapaxes(a, -1, -2)) > 1.0).astype(jnp.float32)
    adj = adj + jnp.eye(N, dtype=jnp.float32)[None]          # A~ with self-loops

    # Deterministic Xavier-uniform style init for the two linear layers.
    w_embed = (jax.random.uniform(k3, (F_IN, F_OUT), jnp.float32, -1.0, 1.0)
               * jnp.sqrt(6.0 / (F_IN + F_OUT)))
    b_embed = jnp.zeros((F_OUT,), jnp.float32)
    w_assign = (jax.random.uniform(k4, (F_IN, C), jnp.float32, -1.0, 1.0)
                * jnp.sqrt(6.0 / (F_IN + C)))
    b_assign = jnp.zeros((C,), jnp.float32)

    new_x, new_adj = diffpool_layer(x, adj, w_embed, b_embed, w_assign, b_assign)
    jax.block_until_ready((new_x, new_adj))

    # Sanity check against a pure-JAX f32 reference.  Tolerance covers the
    # bf16 MXU operands on the adjacency path (x / S rounded to bf16, f32
    # accumulation) plus the approx-reciprocal softmax normalization.
    ref_x, ref_adj = jax.vmap(
        lambda xx, aa: _reference_single(xx, aa, w_embed, b_embed,
                                         w_assign, b_assign))(x, adj)
    assert jnp.allclose(new_x, ref_x, atol=2e-2, rtol=2e-2), "newX mismatch"
    assert jnp.allclose(new_adj, ref_adj, atol=2e-2, rtol=2e-2), "newAdj mismatch"

    print("KERNEL_OK")
</pallas_src>

<mosaic_0001>
module attributes {stable_mosaic.version = 11 : i64} {
  func.func @_diffpool_kernel(%arg0: i32, %arg1: memref<2x16x8xbf16, #tpu.memory_space<vmem>>, %arg2: memref<2x16x16xbf16, #tpu.memory_space<vmem>>, %arg3: memref<8x256xf32, #tpu.memory_space<vmem>>, %arg4: memref<1x256xf32, #tpu.memory_space<vmem>>, %arg5: memref<2x8x128xf32, #tpu.memory_space<vmem>>, %arg6: memref<2x8x128xf32, #tpu.memory_space<vmem>>) attributes {dimension_semantics = [#tpu.dimension_semantics<parallel>], iteration_bounds = array<i64: 2>, scalar_prefetch = 0 : i64, scratch_operands = 0 : i64, tpu.core_type = #tpu.core_type<tc>, window_params = [{transform_indices = @transform_0, window_bounds = array<i64: 2, 16, 8>}, {transform_indices = @transform_1, window_bounds = array<i64: 2, 16, 16>}, {pipeline_mode = #tpu.pipeline_mode<synchronous>, transform_indices = @transform_2, window_bounds = array<i64: 8, 256>}, {pipeline_mode = #tpu.pipeline_mode<synchronous>, transform_indices = @transform_3, window_bounds = array<i64: 1, 256>}, {transform_indices = @transform_4, window_bounds = array<i64: 2, 8, 128>}, {transform_indices = @transform_5, window_bounds = array<i64: 2, 8, 128>}]} {
    %c0 = arith.constant 0 : index
    %c0_0 = arith.constant 0 : index
    %c0_1 = arith.constant 0 : index
    %0 = vector.load %arg2[%c0, %c0_0, %c0_1] : memref<2x16x16xbf16, #tpu.memory_space<vmem>>, vector<2x16x16xbf16>
    %c0_2 = arith.constant 0 : index
    %c0_3 = arith.constant 0 : index
    %c0_4 = arith.constant 0 : index
    %1 = vector.load %arg1[%c0_2, %c0_3, %c0_4] : memref<2x16x8xbf16, #tpu.memory_space<vmem>>, vector<2x16x8xbf16>
    "tpu.trace_start"() <{level = 10 : i32, message = "gnm,gmf->gnf"}> : () -> ()
    %cst = arith.constant dense<0.000000e+00> : vector<2x16x8xf32>
    %2 = tpu.matmul %0, %1, %cst {dimension_numbers = #tpu.dot_dimension_numbers<[2], [1], [1], [2], [0, 0, 0, 1, 1, 2], [0], [0]>} : vector<2x16x16xbf16>, vector<2x16x8xbf16>, vector<2x16x8xf32> -> vector<2x16x8xf32>
    "tpu.trace_stop"() : () -> ()
    %3 = vector.shape_cast %2 : vector<2x16x8xf32> to vector<32x8xf32>
    %c0_5 = arith.constant 0 : index
    %c0_6 = arith.constant 0 : index
    %4 = vector.load %arg3[%c0_5, %c0_6] : memref<8x256xf32, #tpu.memory_space<vmem>>, vector<8x256xf32>
    %cst_7 = arith.constant dense<0.000000e+00> : vector<32x256xf32>
    %5 = tpu.matmul %3, %4, %cst_7 {dimension_numbers = #tpu.dot_dimension_numbers<[1], [0], [0], [1], [0, 0, 1, 1], [], []>} : vector<32x8xf32>, vector<8x256xf32>, vector<32x256xf32> -> vector<32x256xf32>
    %c0_8 = arith.constant 0 : index
    %c0_9 = arith.constant 0 : index
    %6 = vector.load %arg4[%c0_8, %c0_9] : memref<1x256xf32, #tpu.memory_space<vmem>>, vector<1x256xf32>
    %7 = vector.broadcast %6 : vector<1x256xf32> to vector<32x256xf32>
    %8 = arith.addf %5, %7 : vector<32x256xf32>
    %9 = vector.extract_strided_slice %8 {offsets = [0, 0], sizes = [32, 128], strides = [1, 1]} : vector<32x256xf32> to vector<32x128xf32>
    %cst_10 = arith.constant 0.000000e+00 : f32
    %10 = vector.broadcast %cst_10 : f32 to vector<32x128xf32>
    %11 = arith.maximumf %9, %10 : vector<32x128xf32>
    %12 = arith.mulf %11, %11 : vector<32x128xf32>
    %cst_11 = arith.constant dense<0.000000e+00> : vector<32xf32>
    %13 = vector.multi_reduction <add>, %12, %cst_11 [1] : vector<32x128xf32> to vector<32xf32>
    %14 = vector.shape_cast %13 : vector<32xf32> to vector<32x1xf32>
    %cst_12 = arith.constant 9.99999996E-13 : f32
    %15 = vector.broadcast %cst_12 : f32 to vector<32x1xf32>
    %16 = arith.addf %14, %15 : vector<32x1xf32>
    %17 = math.rsqrt %16 : vector<32x1xf32>
    %18 = vector.broadcast %17 : vector<32x1xf32> to vector<32x128xf32>
    %19 = arith.mulf %11, %18 : vector<32x128xf32>
    %20 = vector.extract_strided_slice %8 {offsets = [0, 128], sizes = [32, 128], strides = [1, 1]} : vector<32x256xf32> to vector<32x128xf32>
    %cst_13 = arith.constant dense<0xFF800000> : vector<32xf32>
    %21 = vector.multi_reduction <maximumf>, %20, %cst_13 [1] : vector<32x128xf32> to vector<32xf32>
    %22 = vector.shape_cast %21 : vector<32xf32> to vector<32x1xf32>
    %23 = vector.broadcast %22 : vector<32x1xf32> to vector<32x128xf32>
    %24 = arith.subf %20, %23 : vector<32x128xf32>
    %25 = math.exp %24 : vector<32x128xf32>
    %cst_14 = arith.constant dense<0.000000e+00> : vector<32xf32>
    %26 = vector.multi_reduction <add>, %25, %cst_14 [1] : vector<32x128xf32> to vector<32xf32>
    %27 = vector.shape_cast %26 : vector<32xf32> to vector<32x1xf32>
    %28 = tpu.reciprocal %27 {approx = true} : vector<32x1xf32> -> vector<32x1xf32>
    %29 = vector.broadcast %28 : vector<32x1xf32> to vector<32x128xf32>
    %30 = arith.mulf %25, %29 : vector<32x128xf32>
    %31 = vector.shape_cast %19 : vector<32x128xf32> to vector<2x16x128xf32>
    %32 = vector.shape_cast %30 : vector<32x128xf32> to vector<2x16x128xf32>
    %33 = tpu.transpose %32, [0, 2, 1] : vector<2x16x128xf32> -> vector<2x128x16xf32>
    %34 = vector.extract_strided_slice %33 {offsets = [0, 0, 0], sizes = [2, 8, 16], strides = [1, 1, 1]} : vector<2x128x16xf32> to vector<2x8x16xf32>
    "tpu.trace_start"() <{level = 10 : i32, message = "gcn,gnf->gcf"}> : () -> ()
    %cst_15 = arith.constant dense<0.000000e+00> : vector<2x8x128xf32>
    %35 = tpu.matmul %34, %31, %cst_15 {dimension_numbers = #tpu.dot_dimension_numbers<[2], [1], [1], [2], [0, 0, 0, 1, 1, 2], [0], [0]>} : vector<2x8x16xf32>, vector<2x16x128xf32>, vector<2x8x128xf32> -> vector<2x8x128xf32>
    "tpu.trace_stop"() : () -> ()
    %c0_16 = arith.constant 0 : index
    %c0_17 = arith.constant 0 : index
    %c0_18 = arith.constant 0 : index
    %36 = vector.load %arg5[%c0_16, %c0_17, %c0_18] : memref<2x8x128xf32, #tpu.memory_space<vmem>>, vector<2x8x128xf32>
    tpu.vector_store %arg5[%c0_16, %c0_17, %c0_18], %35 {strides = array<i32>} : memref<2x8x128xf32, #tpu.memory_space<vmem>>, vector<2x8x128xf32>,
    %37 = arith.truncf %34 : vector<2x8x16xf32> to vector<2x8x16xbf16>
    "tpu.trace_start"() <{level = 10 : i32, message = "gcn,gnm->gcm"}> : () -> ()
    %cst_19 = arith.constant dense<0.000000e+00> : vector<2x8x16xf32>
    %38 = tpu.matmul %37, %0, %cst_19 {dimension_numbers = #tpu.dot_dimension_numbers<[2], [1], [1], [2], [0, 0, 0, 1, 1, 2], [0], [0]>} : vector<2x8x16xbf16>, vector<2x16x16xbf16>, vector<2x8x16xf32> -> vector<2x8x16xf32>
    "tpu.trace_stop"() : () -> ()
    "tpu.trace_start"() <{level = 10 : i32, message = "gcm,gmk->gck"}> : () -> ()
    %cst_20 = arith.constant dense<0.000000e+00> : vector<2x8x128xf32>
    %39 = tpu.matmul %38, %32, %cst_20 {dimension_numbers = #tpu.dot_dimension_numbers<[2], [1], [1], [2], [0, 0, 0, 1, 1, 2], [0], [0]>} : vector<2x8x16xf32>, vector<2x16x128xf32>, vector<2x8x128xf32> -> vector<2x8x128xf32>
    "tpu.trace_stop"() : () -> ()
    %c0_21 = arith.constant 0 : index
    %c0_22 = arith.constant 0 : index
    %c0_23 = arith.constant 0 : index
    %40 = vector.load %arg6[%c0_21, %c0_22, %c0_23] : memref<2x8x128xf32, #tpu.memory_space<vmem>>, vector<2x8x128xf32>
    tpu.vector_store %arg6[%c0_21, %c0_22, %c0_23], %39 {strides = array<i32>} : memref<2x8x128xf32, #tpu.memory_space<vmem>>, vector<2x8x128xf32>,
    return
  }
  func.func @transform_0(%arg0: i32) -> (i32, i32, i32) {
    %c0_i32 = arith.constant 0 : i32
    %c0_i32_0 = arith.constant 0 : i32
    %c0_i32_1 = arith.constant 0 : i32
    return %arg0, %c0_i32, %c0_i32_0 : i32, i32, i32
  }
  func.func @transform_1(%arg0: i32) -> (i32, i32, i32) {
    %c0_i32 = arith.constant 0 : i32
    %c0_i32_0 = arith.constant 0 : i32
    %c0_i32_1 = arith.constant 0 : i32
    return %arg0, %c0_i32, %c0_i32_0 : i32, i32, i32
  }
  func.func @transform_2(%arg0: i32) -> (i32, i32) {
    %c0_i32 = arith.constant 0 : i32
    %c0_i32_0 = arith.constant 0 : i32
    %c0_i32_1 = arith.constant 0 : i32
    return %c0_i32, %c0_i32_0 : i32, i32
  }
  func.func @transform_3(%arg0: i32) -> (i32, i32) {
    %c0_i32 = arith.constant 0 : i32
    %c0_i32_0 = arith.constant 0 : i32
    %c0_i32_1 = arith.constant 0 : i32
    return %c0_i32, %c0_i32_0 : i32, i32
  }
  func.func @transform_4(%arg0: i32) -> (i32, i32, i32) {
    %c0_i32 = arith.constant 0 : i32
    %c0_i32_0 = arith.constant 0 : i32
    %c0_i32_1 = arith.constant 0 : i32
    return %arg0, %c0_i32, %c0_i32_0 : i32, i32, i32
  }
  func.func @transform_5(%arg0: i32) -> (i32, i32, i32) {
    %c0_i32 = arith.constant 0 : i32
    %c0_i32_0 = arith.constant 0 : i32
    %c0_i32_1 = arith.constant 0 : i32
    return %arg0, %c0_i32, %c0_i32_0 : i32, i32, i32
  }
}

</mosaic_0001>

<bundles_post_ra>
// kernel: tpu_custom_call.1
= control target key start
LH: loop header
LB: loop body
LE: loop exit
PB: predicated region body
PF: predicated region fallthrough
CT: control target
= control target key end

     0   :  { %11 = vsyncpa [#allocation3], 0  ;;  %s1287_s0 = inlined_call_operand.vmem [shape: bf16[4,16,8], index: 0, kind: input, shape index: {}]   ;;  %s1288_s1 = inlined_call_operand.vmem [shape: bf16[4,16,16], index: 1, kind: input, shape index: {}]   ;;  %s1289_s2 = inlined_call_operand.vmem [shape: f32[8,256], index: 2, kind: input, shape index: {}]   ;;  %s1290_s3 = inlined_call_operand.vmem [shape: f32[1,256], index: 3, kind: input, shape index: {}]   ;;  %s1291_s4 = inlined_call_operand.hbm [shape: f32[4,8,128], index: 4, kind: output, shape index: {0}]   ;;  %s1292_s5 = inlined_call_operand.hbm [shape: f32[4,8,128], index: 5, kind: output, shape index: {1}]  }
   0x1   :  { %13 = vsyncpa [#allocation3 + $0x1], 0 }
   0x2   :  { %14 = vsyncpa [#allocation5], 0 }
   0x3   :  { %16 = vsyncpa [#allocation5 + $0x1], 0  ;;  %s1111_s18 = smov 0   ;;  %s1113_s19 = smov 0  }
   0x4   :  { %s1115_s20 = smov 0   ;;  %s1117_s21 = smov 0  }
   0x5 LB: > { %s1132_s22 = sadd.s32 4294967295, %s1077_s21   ;;  %s852_s23 = sadd.s32 4294967294, %s1077_s21   ;;  %s1077_s21 = sphi %s1117_s21, %s1298_s21   ;;  %s1073_s20 = sphi %s1115_s20, %s1297_s20   ;;  %s1069_s19 = sphi %s1113_s19, %s1296_s19   ;;  %s1065_s18 = sphi %s1111_s18, %s1295_s18  }
   0x6   : > { %s1136_s24 = sadd.s32 1, %s1077_s21   ;;  %s123_s25 = sadd.s32 1, %s1073_s20 }
   0x7   : > { %s120_s26 = ssub.s32 %s1077_s21, %s1136_s24  ;;  %p133_p0 = scmp.ne.s32.totalorder %s1073_s20, %s1069_s19 }
   0x8   : > { %p121_p1 = scmp.eq.s32.totalorder %s120_s26, 0  ;;  %p134_p2 = scmp.eq.s32.totalorder %s1132_s22, 1 }
   0x9   : > { %p139_p3 = scmp.ne.s32.totalorder %s1069_s19, %s1065_s18  ;;  %p140_p4 = scmp.eq.s32.totalorder %s852_s23, 1 }
   0xa   : > { %s1147_s27 = scalar_select %p121_p1, %s1073_s20, %s123_s25  }
   0xb   : > { %p1149_p5 = por %p134_p2, %p133_p0  ;;  %p1153_p6 = por %p140_p4, %p139_p3 }
   0xc   : > { %p855_p7 = scmp.ge.s32.totalorder %s1077_s21, 1  ;;  %p210_p8 = scmp.lt.s32.totalorder %s1077_s21, 3 }
   0xe   : > { %p211_p9 = pnand %p855_p7, %p210_p8 }
   0xf   : > { %s858_s30 = sshll.u32 (!%p211_p9), %s1132_s22, 1  ;;  %s1226_s25 = sand.u32 (!%p211_p9), 1, %s1069_s19  }
  0x10   : > { %214 = sbr.rel (%p211_p9) target bundleno = 990 (0x3de), region = 36  ;;  %p251_p10 = scmp.lt.s32.totalorder (!%p211_p9), %s858_s30, 3 }
  0x11   : > { %s856_s26 = sshll.u32 (!%p211_p9), %s1226_s25, 4  ;;  %s910_s7 = sshll.u32 (!%p211_p9), %s1132_s22, 4 }
  0x12   : > { %s724_s10 = scalar_lea.hbm (!%p211_p9), %s1291_s4, %s910_s7  ;;  %s1003_s17 = scalar_lea.hbm (!%p211_p9), %s1291_s4, 32 }
  0x13   : > { %s727_s11 = sshll.u32 (!%p211_p9), %s724_s10, 4  ;;  %s728_s11 = int_to_ptr.hbm [resolvable:$true] %s727_s11 }
  0x14   : > { %s997_s13 = sshra.s32 (!%p211_p9), %s728_s11, 4  ;;  %s998_s13 = int_to_ptr.hbm [resolvable:$true] %s997_s13 }
  0x15   : > { %s1300_s30 = smov (!%p251_p10, %s858_s30), 3  ;;  %vm286_vm0 = vcmask 130048   ;;  %v332_v4 = vld [vmem:[%s1289_s2] sm:$0xff]  ;;  %v333_v5 = vld [vmem:[%s1289_s2 + $0x8] sm:$0xff]  ;;  %vm340_vm1 = vcmask 64512   ;;  %s999_s14 = scalar_lea.hbm %s998_s13, 16 }
  0x16   : > { %s904_s6 = sshll.u32 %s1300_s30, 3  ;;  %368 = vmatpush.msra.mxu2 %v332_v4  ;;  %397 = vmatpush.msra.mxu3 %v333_v5  ;;  %v334_v10 = vld [vmem:[%s1290_s3] sm:$0x3]  ;;  %s242_s30 = scalar_lea.vmem [#allocation2], %s856_s26 }
  0x17   : > { %s255_s9 = scalar_lea.vmem %s1287_s0, %s904_s6  ;;  %s262_s12 = scalar_lea.vmem %s1288_s1, %s904_s6  ;;  %v337_v11 = vperm.slane %v334_v10, 1  ;;  %v336_v18 = vperm.slane %v334_v10, 0 }
  0x18   : > { %v908_v0 = vld [vmem:[%s255_s9] sm:$0xff]  ;;  %v909_v1 = vld [vmem:[%s255_s9 + $0x8] sm:$0xff]  ;;  %s725_s6 = sshll.u32 %s242_s30, 4  ;;  %p1000_p11 = scmp.ne.s32.totalorder %s998_s13, %s999_s14  ;;  %s726_s6 = int_to_ptr.vmem [resolvable:$true] %s725_s6 }
  0x19   : > { %v1166_v2 = vld [vmem:[%s262_s12] sm:$0xff]  ;;  %v1168_v3 = vld [vmem:[%s262_s12 + $0x8] sm:$0xff]  ;;  %297 = vmatpush.bf16.msra.mxu0 %v908_v0  ;;  %325 = vmatpush.bf16.msra.mxu1 %v909_v1  ;;  %s708_s12 = scalar_lea.sflag [#allocation3], %s1226_s25  ;;  %p1004_p0 = scmp.lt.s32.totalorder %s998_s13, %s1291_s4 }
  0x1a   : > { %p1001_p12 = pnand %p1000_p11, %p1149_p5  ;;  %p1005_p1 = scmp.lt.s32.totalorder %s1003_s17, %s999_s14 }
  0x1c   : > { %872 = vmatmul.msk.bf16.vlgmr.msra.gmra.mxu0 %vm286_vm0, %v1166_v2  ;;  %881 = vmatmul.msk.bf16.vlgmr.msra.gmra.mxu1 %vm286_vm0, %v1168_v3  ;;  %p1002_p13 = pneg %p1001_p12  ;;  %p1006_p2 = por %p1005_p1, %p1004_p0 }
  0x1e   : > { %p1007_p3 = pnand %p1006_p2, %p1002_p13 }
  0x99   : > { %v299_v6 = vpop.f32.mrf.mxu0  ;;  %v327_v8 = vpop.f32.mrf.mxu1 }
  0x9a   : > { %882 = vmatmul.msk.f32.vlgmr.msra.gmra.mxu2 %vm340_vm1, %v299_v6  ;;  %886 = vmatmul.msk.f32.vlgmr.msra.gmra.mxu3 %vm340_vm1, %v299_v6 }
  0xa1   : > { %v301_v7 = vpop.f32.mrf.mxu0  ;;  %v329_v9 = vpop.f32.mrf.mxu1 }
  0xa2   : > { %883 = vmatmul.msk.f32.gmra.mxu2 %vm340_vm1, %v301_v7  ;;  %887 = vmatmul.msk.f32.gmra.mxu3 %vm340_vm1, %v301_v7 }
  0xaa   : > { %884 = vmatmul.msk.f32.gmra.mxu2 %vm340_vm1, %v327_v8  ;;  %888 = vmatmul.msk.f32.gmra.mxu3 %vm340_vm1, %v327_v8 }
  0xb2   : > { %885 = vmatmul.msk.f32.gmra.mxu2 %vm340_vm1, %v329_v9  ;;  %889 = vmatmul.msk.f32.gmra.mxu3 %vm340_vm1, %v329_v9 }
 0x11d   : > { %v370_v12 = vpop.f32.mrf.mxu2  ;;  %v399_v13 = vpop.f32.mrf.mxu3 }
 0x11e   : > { %v400_v14 = vadd.f32 %v399_v13, %v337_v11  ;;  %v371_v26 = vadd.f32 %v370_v12, %v336_v18 }
 0x120   : > { %475 = vmax.xlane.f32.xlu0 %v400_v14  ;;  %v1187_v29 = vmax.f32 %v371_v26, 0.0 }
 0x122   : > { %v415_v32 = vmul.f32 %v1187_v29, %v1187_v29 }
 0x125   : > { %v373_v15 = vpop.f32.mrf.mxu2  ;;  %v402_v16 = vpop.f32.mrf.mxu3 }
 0x126   : > { %v403_v17 = vadd.f32 %v402_v16, %v337_v11  ;;  %v374_v21 = vadd.f32 %v373_v15, %v336_v18 }
 0x128   : > { %477 = vmax.xlane.f32.xlu1 %v403_v17  ;;  %v1183_v24 = vmax.f32 %v374_v21, 0.0 }
 0x12a   : > { %v416_v28 = vmul.f32 %v1183_v24, %v1183_v24 }
 0x12d   : > { %v376_v19 = vpop.f32.mrf.mxu2  ;;  %v405_v20 = vpop.f32.mrf.mxu3 }
 0x12e   : > { %v377_v22 = vadd.f32 %v376_v19, %v336_v18  ;;  %v406_v23 = vadd.f32 %v405_v20, %v337_v11 }
 0x130   : > { %479 = vmax.xlane.f32.xlu0 %v406_v23  ;;  %v1204_v52 = vmax.f32 %v377_v22, 0.0 }
 0x132   : > { %v417_v57 = vmul.f32 %v1204_v52, %v1204_v52 }
 0x135   : > { %v408_v25 = vpop.f32.mrf.mxu3  ;;  %v379_v30 = vpop.f32.mrf.mxu2 }
 0x136   : > { %v409_v27 = vadd.f32 %v408_v25, %v337_v11  ;;  %v380_v31 = vadd.f32 %v379_v30, %v336_v18 }
 0x138   : > { %481 = vmax.xlane.f32.xlu1 %v409_v27  ;;  %421 = vadd.xlane.f32.xlu0 %v416_v28  ;;  %v1191_v33 = vmax.f32 %v380_v31, 0.0 }
 0x13a   : > { %v418_v34 = vmul.f32 %v1191_v33, %v1191_v33 }
 0x140   : > { %419 = vadd.xlane.f32.xlu1 %v415_v32 }
 0x148   : > { %425 = vadd.xlane.f32.xlu1 %v418_v34 }
 0x193   : > { %v476_v35 = vpop.xlane.xlu0 %475 }
 0x194   : > { %v483_v36 = vsub.f32 %v400_v14, %v476_v35 }
 0x196   : > { %v487_v37 = vmul.f32 1.442695, %v483_v36 }
 0x198   : > { %959 = vpow2.f32 %v487_v37 }
 0x19b   : > { %v478_v38 = vpop.xlane.xlu1 %477 }
 0x19c   : > { %v484_v39 = vsub.f32 %v403_v17, %v478_v38 }
 0x19e   : > { %v1195_v40 = vpop.eup %959  ;;  %v489_v41 = vmul.f32 1.442695, %v484_v39 }
 0x19f   : > { %495 = vadd.xlane.f32.xlu2 %v1195_v40 }
 0x1a0   : > { %961 = vpow2.f32 %v489_v41 }
 0x1a3   : > { %v480_v42 = vpop.xlane.xlu0 %479 }
 0x1a4   : > { %v485_v43 = vsub.f32 %v406_v23, %v480_v42 }
 0x1a6   : > { %v1198_v44 = vpop.eup %961  ;;  %v491_v45 = vmul.f32 1.442695, %v485_v43 }
 0x1a7   : > { %497 = vadd.xlane.f32.xlu2 %v1198_v44 }
 0x1a8   : > { %963 = vpow2.f32 %v491_v45 }
 0x1ab   : > { %v482_v46 = vpop.xlane.xlu1 %481  ;;  %v422_v47 = vpop.xlane.xlu0 %421 }
 0x1ac   : > { %v486_v48 = vsub.f32 %v409_v27, %v482_v46  ;;  %v428_v49 = vadd.f32 1e-12, %v422_v47 }
 0x1ae   : > { %v1201_v50 = vpop.eup %963  ;;  %v493_v51 = vmul.f32 1.442695, %v486_v48  ;;  %965 = vrsqrt.f32 %v428_v49  ;;  %vm447_vm3 = vweird.f32 %v428_v49 }
 0x1af   : > { %499 = vadd.xlane.f32.xlu2 %v1201_v50 }
 0x1b0   : > { %967 = vpow2.f32 %v493_v51 }
 0x1b3   : > { %v420_v53 = vpop.xlane.xlu1 %419 }
 0x1b4   : > { %v966_v54 = vpop.eup %965  ;;  %v427_v55 = vadd.f32 1e-12, %v420_v53 }
 0x1b5   : > { %v442_v56 = vmul.f32 %v966_v54, %v428_v49  ;;  %vm448_vm2 = vweird.f32 %v966_v54 }
 0x1b6   : > { %v1208_v58 = vpop.eup %967  ;;  %969 = vrsqrt.f32 %v427_v55  ;;  %vm449_vm4 = vmor %vm447_vm3, %vm448_vm2  ;;  %vm437_vm6 = vweird.f32 %v427_v55 }
 0x1b7   : > { %v443_v59 = vmul.f32 %v966_v54, %v442_v56  ;;  %423 = vadd.xlane.f32.xlu2 %v417_v57  ;;  %501 = vadd.xlane.f32.xlu0 %v1208_v58 }
 0x1b9   : > { %v444_v60 = vmul.f32 0.5, %v443_v59 }
 0x1bb   : > { %v445_v61 = vsub.f32 1.5, %v444_v60  ;;  %v426_v62 = vpop.xlane.xlu1 %425 }
 0x1bc   : > { %v970_v63 = vpop.eup %969  ;;  %v430_v0 = vadd.f32 1e-12, %v426_v62 }
 0x1bd   : > { %v432_v1 = vmul.f32 %v970_v63, %v427_v55  ;;  %v446_v4 = vmul.f32 %v966_v54, %v445_v61  ;;  %vm438_vm5 = vweird.f32 %v970_v63 }
 0x1be   : > { %971 = vrsqrt.f32 %v430_v0  ;;  %vm439_vm7 = vmor %vm437_vm6, %vm438_vm5  ;;  %vm467_vm9 = vweird.f32 %v430_v0 }
 0x1bf   : > { %v433_v5 = vmul.f32 %v970_v63, %v432_v1  ;;  %v450_v6 = vsel %vm449_vm4, %v966_v54, %v446_v4 }
 0x1c0   : > { %v472_v7 = vmul.f32 %v450_v6, %v1183_v24 }
 0x1c1   : > { %v434_v8 = vmul.f32 0.5, %v433_v5 }
 0x1c2   : > { %592 = vmatpush.msrb.mxu0 %v472_v7 }
 0x1c3   : > { %v435_v9 = vsub.f32 1.5, %v434_v8 }
 0x1c4   : > { %v972_v10 = vpop.eup %971 }
 0x1c5   : > { %v462_v11 = vmul.f32 %v972_v10, %v430_v0  ;;  %v436_v12 = vmul.f32 %v970_v63, %v435_v9  ;;  %vm468_vm8 = vweird.f32 %v972_v10 }
 0x1c6   : > { %vm469_vm10 = vmor %vm467_vm9, %vm468_vm8 }
 0x1c7   : > { %v463_v13 = vmul.f32 %v972_v10, %v462_v11  ;;  %v440_v14 = vsel %vm439_vm7, %v970_v63, %v436_v12 }
 0x1c8   : > { %v471_v15 = vmul.f32 %v440_v14, %v1187_v29 }
 0x1c9   : > { %v464_v16 = vmul.f32 0.5, %v463_v13 }
 0x1ca   : > { %593 = vmatpush.msrb.mxu0 %v471_v15 }
 0x1cb   : > { %v465_v17 = vsub.f32 1.5, %v464_v16 }
 0x1cc   : > { %636 = vmatpush.bf16.msra.mxu0 %v1166_v2 }
 0x1cd   : > { %v466_v18 = vmul.f32 %v972_v10, %v465_v17 }
 0x1cf   : > { %v470_v19 = vsel %vm469_vm10, %v972_v10, %v466_v18 }
 0x1d0   : > { %v474_v20 = vmul.f32 %v470_v19, %v1191_v33 }
 0x1d2   : > { %615 = vmatpush.msrb.mxu1 %v474_v20 }
 0x212   : > { %v496_v21 = vpop.xlane.xlu2 %495 }
 0x213   : > { %973 = vrcp.f32 %v496_v21 }
 0x219   : > { %v974_v22 = vpop.eup %973 }
 0x21a   : > { %v498_v23 = vpop.xlane.xlu2 %497  ;;  %v507_v24 = vmul.f32 %v974_v22, %v1195_v40 }
 0x21b   : > { %975 = vrcp.f32 %v498_v23 }
 0x21c   : > { %511 = vxpose.xlu0.b32.start [1/2] (short) (narrow) %v507_v24, 8 }
 0x221   : > { %v976_v25 = vpop.eup %975 }
 0x222   : > { %v500_v26 = vpop.xlane.xlu2 %499  ;;  %v508_v27 = vmul.f32 %v976_v25, %v1198_v44 }
 0x223   : > { %977 = vrcp.f32 %v500_v26 }
 0x224   : > { %676 = vmatpush.msrb.mxu2 %v508_v27  ;;  %512 = vxpose.xlu0.b32.end [2/2] (short) (narrow) %v508_v27, 8 }
 0x226   : > { %677 = vmatpush.msrb.mxu2 %v507_v24 }
 0x229   : > { %v978_v2 = vpop.eup %977 }
 0x22a   : > { %v424_v28 = vpop.xlane.xlu2 %423  ;;  %v502_v29 = vpop.xlane.xlu0 %501  ;;  %v509_v30 = vmul.f32 %v978_v2, %v1201_v50 }
 0x22b   : > { %v429_v31 = vadd.f32 1e-12, %v424_v28  ;;  %979 = vrcp.f32 %v502_v29 }
 0x22c   : > { %543 = vxpose.xlu1.b32.start [1/2] (short) (narrow) %v509_v30, 8 }
 0x22d   : > { %981 = vrsqrt.f32 %v429_v31  ;;  %vm457_vm12 = vweird.f32 %v429_v31 }
 0x231   : > { %v980_v32 = vpop.eup %979 }
 0x232   : > { %v510_v33 = vmul.f32 %v980_v32, %v1208_v58 }
 0x233   : > { %v982_v34 = vpop.eup %981 }
 0x234   : > { %v452_v35 = vmul.f32 %v982_v34, %v429_v31  ;;  %544 = vxpose.xlu1.b32.end [2/2] (short) (narrow) %v510_v33, 8  ;;  %699 = vmatpush.msrb.mxu3 %v510_v33  ;;  %vm458_vm11 = vweird.f32 %v982_v34 }
 0x235   : > { %vm459_vm13 = vmor %vm457_vm12, %vm458_vm11 }
 0x236   : > { %v453_v36 = vmul.f32 %v982_v34, %v452_v35  ;;  %700 = vmatpush.msrb.mxu3 %v509_v30 }
 0x238   : > { %v454_v37 = vmul.f32 0.5, %v453_v36 }
 0x23a   : > { %v455_v38 = vsub.f32 1.5, %v454_v37 }
 0x23c   : > { %v456_v39 = vmul.f32 %v982_v34, %v455_v38 }
 0x23e   : > { %v460_v40 = vsel %vm459_vm13, %v982_v34, %v456_v39 }
 0x23f   : > { %v473_v41 = vmul.f32 %v460_v40, %v1204_v52 }
 0x241   : > { %616 = vmatpush.msrb.mxu1 %v473_v41 }
 0x243   : > { %653 = vmatpush.bf16.msra.mxu1 %v1168_v3 }
 0x2c0   : > { %v527_v42 = vpop.trf.xlu0 }
 0x2c1   : > { %890 = vmatmul.msk.f32.vlgmr.msrb.gmra.mxu0 %vm286_vm0, %v527_v42  ;;  %v623_v43 = vpack.c.bf16 %v527_v42, %v527_v42 }
 0x2c9   : > { %892 = vmatmul.msk.bf16.vlgmr.msra.gmra.mxu0 %vm286_vm0, %v623_v43 }
 0x2d0   : > { %v559_v44 = vpop.trf.xlu1 }
 0x2d1   : > { %891 = vmatmul.msk.f32.vlgmr.msrb.gmra.mxu1 %vm286_vm0, %v559_v44  ;;  %v624_v45 = vpack.c.bf16 %v559_v44, %v559_v44 }
 0x2d9   : > { %893 = vmatmul.msk.bf16.vlgmr.msra.gmra.mxu1 %vm286_vm0, %v624_v45 }
 0x33e   : > { %v595_v46 = vpop.f32.mrf.mxu0 }
 0x33f   : > { %621 = vst [vmem:[%s242_s30] sm:$0xff] %v595_v46 }
 0x346   : > { %v638_v3 = vpop.f32.mrf.mxu0 }
 0x347   : > { %894 = vmatmul.msk.f32.vlgmr.msrb.gmra.mxu2 %vm286_vm0, %v638_v3 }
 0x34e   : > { %v618_v47 = vpop.f32.mrf.mxu1  ;;  %v640_v48 = vpop.f32.mrf.mxu0 }
 0x34f   : > { %622 = vst [vmem:[%s242_s30 + $0x8] sm:$0xff] %v618_v47 }
 0x356   : > { %v655_v49 = vpop.f32.mrf.mxu1 }
 0x357   : > { %895 = vmatmul.msk.f32.vlgmr.msrb.gmra.mxu3 %vm286_vm0, %v655_v49 }
 0x358   : > { %1010 = shalt.err (!%p1007_p3)
}
 0x359   : > { %s1079_s30 = smov 128   ;;  %s1080_s8 = smov 8  }
 0x35a   : > { %912 = dma.vmem_to_hbm [thread:$0]  (%p1149_p5), %s726_s6, 256, %s728_s11, %s708_s12, %s1079_s30, %s1079_s30, %s1080_s8  }
 0x35b   : > { %s249_s9 = scalar_lea.vmem [#allocation4], %s856_s26  ;;  %s741_s14 = scalar_lea.hbm %s1292_s5, %s910_s7 }
 0x35c   : > { %s742_s15 = sshll.u32 %s249_s9, 4  ;;  %s744_s16 = sshll.u32 %s741_s14, 4  ;;  %s743_s15 = int_to_ptr.vmem [resolvable:$true] %s742_s15  ;;  %s745_s16 = int_to_ptr.hbm [resolvable:$true] %s744_s16 }
 0x35d   : > { %s713_s17 = scalar_lea.sflag [#allocation5], %s1226_s25  ;;  %s1025_s22 = sshra.s32 %s745_s16, 4  ;;  %s1026_s22 = int_to_ptr.hbm [resolvable:$true] %s1025_s22 }
 0x35e   : > { %v657_v50 = vpop.f32.mrf.mxu1  ;;  %s1027_s6 = scalar_lea.hbm %s1026_s22, 16  ;;  %s1031_s12 = scalar_lea.hbm %s1292_s5, 32 }
 0x35f   : > { %p1028_p4 = scmp.ne.s32.totalorder %s1026_s22, %s1027_s6  ;;  %p1032_p9 = scmp.lt.s32.totalorder %s1026_s22, %s1292_s5 }
 0x360   : > { %p1033_p10 = scmp.lt.s32.totalorder %s1031_s12, %s1027_s6 }
 0x361   : > { %p1029_p7 = pnand %p1028_p4, %p1149_p5 }
 0x362   : > { %p1034_p11 = por %p1033_p10, %p1032_p9 }
 0x363   : > { %p1030_p8 = pneg %p1029_p7 }
 0x365   : > { %p1035_p12 = pnand %p1034_p11, %p1030_p8 }
 0x3ca   : > { %v679_v51 = vpop.f32.mrf.mxu2 }
 0x3cb   : > { %705 = vst [vmem:[%s249_s9] sm:$0xff] %v679_v51 }
 0x3da   : > { %v702_v52 = vpop.f32.mrf.mxu3 }
 0x3db   : > { %706 = vst [vmem:[%s249_s9 + $0x8] sm:$0xff] %v702_v52 }
 0x3dc   : > { %1038 = shalt.err (!%p1035_p12)
}
 0x3dd   : > { %913 = dma.vmem_to_hbm [thread:$0]  (%p1149_p5), %s743_s15, 256, %s745_s16, %s713_s17, %s1079_s30, %s1079_s30, %s1080_s8  }
 0x3de PF: > { %p923_p13 = scmp.ge.s32.totalorder %s1077_s21, 2  ;;  %s759_s25 = sand.u32 1, %s1065_s18  }
 0x3df   : > { %s760_s9 = scalar_lea.sflag [#allocation3], %s759_s25 }
 0x3e0   : > { %p917_p0 = pnand %p923_p13, %p1153_p6 }
 0x3e2   : > { %p918_p1 = pneg %p917_p0 }
 0x3e4   : > { %1056 = dma.done.wait (%p918_p1), %s760_s9, 256  }
 0x3e5   : > { %1058 = vsyncadd (%p918_p1), %s760_s9, 4294967040  ;;  %s770_s10 = scalar_lea.sflag [#allocation5], %s759_s25 }
 0x3e6   : > { %1060 = dma.done.wait (%p918_p1), %s770_s10, 256  }
 0x3e7   : > { %1062 = vsyncadd (%p918_p1), %s770_s10, 4294967040  ;;  %p19_p5 = scmp.ge.s32.totalorder %s1136_s24, 4   ;;  %s1295_s18 = smov %s1069_s19 }
 0x3e8   : > { %s1296_s19 = smov %s1073_s20  ;;  %s1297_s20 = smov %s1147_s27 }
 0x3e9   : > { %s1298_s21 = smov %s1136_s24  ;;  %21 = sbr.rel (!%p19_p5) target bundleno = 5 (0x5), region = 91 }
 0x3ee   :  { %776 = vsyncpa [#allocation3], 1 }
 0x3ef   :  { %778 = vsyncpa [#allocation3 + $0x1], 1 }
 0x3f0   :  { %779 = vsyncpa [#allocation5], 1 }
 0x3f1   :  { %781 = vsyncpa [#allocation5 + $0x1], 1 }

</bundles_post_ra>
